<compile_context>
chip_gen: v7x
topology: tpu7x:2x2x1
jax: 0.10.0
libtpu: 0.0.40
codegen_flags: <defaults>
</compile_context>

<pallas_src>
import jax
import jax.numpy as jnp
from jax.experimental import pallas as pl
from jax.experimental.pallas import tpu as pltpu

EPS = 1e-5            # nn.LayerNorm default
MAX_TB = 16384        # original batch rows per grid step


def _choose_pack(ds, dg):
    """Largest packing factor that makes both streams 128-lane dense."""
    for p in (16, 8, 4, 2):
        if (p * ds) % 128 == 0 and (p * dg) % 128 == 0:
            return p
    return 1


def _choose_tile(bp, max_tbp):
    """Packed rows per grid step: multiple of 8, >=2 steps when possible (v7x)."""
    if bp <= 8:
        return bp                                   # single tiny full block
    target = min(max(1, max_tbp), -(-bp // 2))      # >=2 steps -> both v7x TCs
    return max(8, ((target + 7) // 8) * 8)


def _stream_contrib(x_ref, r_mean_ref, r_w_ref):
    """rsqrt(var + eps) * sum(x * w') for each 32-wide segment of a packed row.

    All three per-segment reductions (mu, E[x^2], s3) are MXU matmuls against
    block-diagonal RHS tensors -> no XLU lane-reduction trees.
    """
    x = x_ref[...].astype(jnp.float32)
    r_mean = r_mean_ref[...]
    mu = jnp.dot(x, r_mean, preferred_element_type=jnp.float32)        # E[x]
    ex2 = jnp.dot(x * x, r_mean, preferred_element_type=jnp.float32)   # E[x^2]
    s3 = jnp.dot(x, r_w_ref[...], preferred_element_type=jnp.float32)  # sum x*w'
    var = ex2 - mu * mu
    return s3 * jax.lax.rsqrt(var + EPS)


def pro_model_kernel(seq_ref, gat_ref,
                     rm_seq_ref, rw_seq_ref,
                     rm_gat_ref, rw_gat_ref,
                     bias_ref, out_ref):
    acc = _stream_contrib(seq_ref, rm_seq_ref, rw_seq_ref)
    acc = acc + _stream_contrib(gat_ref, rm_gat_ref, rw_gat_ref)
    out_ref[...] = acc + bias_ref[0, 0]


def pro_model_forward(seq_bert_feature, seq_gat_feature, params, *, max_tb=MAX_TB):
    """params use PyTorch layouts: w1 (F, C), b1 (F,), w2 (1, F), b2 (1,),
    LayerNorm gammas/betas (D,)."""
    B, Ds = seq_bert_feature.shape
    B2, Dg = seq_gat_feature.shape
    assert B == B2

    f32 = jnp.float32
    w1 = params["w1"]
    w2 = params["w2"]
    assert w1.shape[1] == Ds + Dg and w2.shape[0] == 1 and w2.shape[1] == w1.shape[0]

    # ---- trace-time folds (valid in eval mode: dropout identity, no nonlinearity)
    w_eff = (w1.T.astype(f32) @ w2.T.astype(f32))[:, 0]          # (Ds+Dg,)
    w_seq, w_gat = w_eff[:Ds], w_eff[Ds:]

    g_seq = params["ln_seq_g"].astype(f32)
    b_seq = params["ln_seq_b"].astype(f32)
    g_gat = params["ln_gat_g"].astype(f32)
    b_gat = params["ln_gat_b"].astype(f32)

    gw_seq = g_seq * w_seq
    gw_gat = g_gat * w_gat
    wp_seq = gw_seq - jnp.sum(gw_seq) / Ds        # gamma*w minus its mean
    wp_gat = gw_gat - jnp.sum(gw_gat) / Dg
    b_total = (jnp.sum(b_seq * w_seq) + jnp.sum(b_gat * w_gat)
               + params["b1"].astype(f32) @ w2[0].astype(f32)
               + params["b2"].astype(f32)[0]).reshape(1, 1)      # scalar, -> SMEM

    # ---- lane packing: (B, D) -> (B/pack, pack*D), free reshape when no pad
    pack = _choose_pack(Ds, Dg)
    b_pad = -(-B // pack) * pack
    if b_pad != B:
        padding = ((0, b_pad - B), (0, 0))
        seq_bert_feature = jnp.pad(seq_bert_feature, padding)
        seq_gat_feature = jnp.pad(seq_gat_feature, padding)
    bp = b_pad // pack

    seq_p = seq_bert_feature.reshape(bp, pack * Ds)
    gat_p = seq_gat_feature.reshape(bp, pack * Dg)

    # block-diagonal reduction RHS: segment j of a packed row -> output column j
    eye = jnp.eye(pack, dtype=f32)
    r_mean_seq = jnp.kron(eye, jnp.full((Ds, 1), 1.0 / Ds, f32))   # (pack*Ds, pack)
    r_mean_gat = jnp.kron(eye, jnp.full((Dg, 1), 1.0 / Dg, f32))
    r_w_seq = jnp.kron(eye, wp_seq.reshape(Ds, 1))
    r_w_gat = jnp.kron(eye, wp_gat.reshape(Dg, 1))

    tbp = _choose_tile(bp, max_tb // pack)
    grid = (pl.cdiv(bp, tbp),)

    par_spec = lambda r, c: pl.BlockSpec((r, c), lambda i: (0, 0))  # DMA'd once

    out_packed = pl.pallas_call(
        pro_model_kernel,
        out_shape=jax.ShapeDtypeStruct((bp, pack), f32),
        grid=grid,
        in_specs=[
            pl.BlockSpec((tbp, pack * Ds), lambda i: (i, 0)),   # seq (streamed)
            pl.BlockSpec((tbp, pack * Dg), lambda i: (i, 0)),   # gat (streamed)
            par_spec(pack * Ds, pack),                          # r_mean_seq
            par_spec(pack * Ds, pack),                          # r_w_seq
            par_spec(pack * Dg, pack),                          # r_mean_gat
            par_spec(pack * Dg, pack),                          # r_w_gat
            pl.BlockSpec(memory_space=pltpu.MemorySpace.SMEM),  # folded scalar bias
        ],
        out_specs=pl.BlockSpec((tbp, pack), lambda i: (i, 0)),
        compiler_params=pltpu.CompilerParams(
            dimension_semantics=("parallel",),
            vmem_limit_bytes=32 * 1024 * 1024,
        ),
    )(seq_p, gat_p, r_mean_seq, r_w_seq, r_mean_gat, r_w_gat, b_total)

    return out_packed.reshape(b_pad, 1)[:B]


def reference_forward(seq_bert_feature, seq_gat_feature, params):
    """Pure-JAX reference mirroring the PyTorch forward (eval mode, unfolded)."""
    def ln(x, g, b):
        mu = jnp.mean(x, axis=-1, keepdims=True)
        var = jnp.mean((x - mu) ** 2, axis=-1, keepdims=True)
        return (x - mu) * jax.lax.rsqrt(var + EPS) * g + b

    seq_n = ln(seq_bert_feature.astype(jnp.float32),
               params["ln_seq_g"], params["ln_seq_b"])
    gat_n = ln(seq_gat_feature.astype(jnp.float32),
               params["ln_gat_g"], params["ln_gat_b"])
    feat = jnp.concatenate([seq_n, gat_n], axis=-1)
    pro = feat @ params["w1"].T + params["b1"]      # nn.Linear: x @ W.T + b
    return pro @ params["w2"].T + params["b2"]


def init_params(key, pro_seq_dim, pro_gat_dim):
    """Parameters in native PyTorch layouts (Linear weight = (out, in))."""
    pro_concat_dim = pro_seq_dim + pro_gat_dim
    pro_final_dim = pro_concat_dim // 2
    ks = jax.random.split(key, 8)
    return {
        "ln_seq_g": 1.0 + 0.1 * jax.random.normal(ks[4], (pro_seq_dim,), jnp.float32),
        "ln_seq_b": 0.1 * jax.random.normal(ks[5], (pro_seq_dim,), jnp.float32),
        "ln_gat_g": 1.0 + 0.1 * jax.random.normal(ks[6], (pro_gat_dim,), jnp.float32),
        "ln_gat_b": 0.1 * jax.random.normal(ks[7], (pro_gat_dim,), jnp.float32),
        "w1": jax.random.normal(ks[0], (pro_final_dim, pro_concat_dim), jnp.float32) * 0.1,
        "b1": jax.random.normal(ks[1], (pro_final_dim,), jnp.float32) * 0.1,
        "w2": jax.random.normal(ks[2], (1, pro_final_dim), jnp.float32) * 0.1,
        "b2": jax.random.normal(ks[3], (1,), jnp.float32) * 0.1,
    }


if __name__ == "__main__":
    pro_seq_dim = 32   # seq_size  (BERT/BiLSTM embedding width)
    pro_gat_dim = 32   # gat_size  (ProGAT embedding width)

    key = jax.random.PRNGKey(0)
    k_seq, k_gat, k_par = jax.random.split(key, 3)
    params = init_params(k_par, pro_seq_dim, pro_gat_dim)

    def run_case(b, max_tb, fold):
        ks = jax.random.fold_in(k_seq, fold)
        kg = jax.random.fold_in(k_gat, fold)
        seq = jax.random.normal(ks, (b, pro_seq_dim), jnp.float32)
        gat = jax.random.normal(kg, (b, pro_gat_dim), jnp.float32)
        out = jax.block_until_ready(
            pro_model_forward(seq, gat, params, max_tb=max_tb))
        ref = reference_forward(seq, gat, params)
        assert out.shape == (b, 1)
        err = float(jnp.max(jnp.abs(out - ref)))
        assert jnp.allclose(out, ref, atol=5e-4, rtol=5e-4), (b, err)

    run_case(4, MAX_TB, 0)      # tiny batch: pads to one packed row, single block
    run_case(2048, 512, 1)      # multi-step pipelined grid (4 steps of 512 rows)
    run_case(1000, MAX_TB, 2)   # pad-to-pack + ragged last grid block

    print("KERNEL_OK")
</pallas_src>

<mosaic_0001>
module attributes {stable_mosaic.version = 11 : i64} {
  func.func @pro_model_kernel(%arg0: i32, %arg1: memref<1x512xf32, #tpu.memory_space<vmem>>, %arg2: memref<1x512xf32, #tpu.memory_space<vmem>>, %arg3: memref<512x16xf32, #tpu.memory_space<vmem>>, %arg4: memref<512x16xf32, #tpu.memory_space<vmem>>, %arg5: memref<512x16xf32, #tpu.memory_space<vmem>>, %arg6: memref<512x16xf32, #tpu.memory_space<vmem>>, %arg7: memref<1x1xf32, #tpu.memory_space<smem>>, %arg8: memref<1x16xf32, #tpu.memory_space<vmem>>) attributes {dimension_semantics = [#tpu.dimension_semantics<parallel>], iteration_bounds = array<i64: 1>, scalar_prefetch = 0 : i64, scratch_operands = 0 : i64, tpu.core_type = #tpu.core_type<tc>, window_params = [{transform_indices = @transform_0, window_bounds = array<i64: 1, 512>}, {transform_indices = @transform_1, window_bounds = array<i64: 1, 512>}, {pipeline_mode = #tpu.pipeline_mode<synchronous>, transform_indices = @transform_2, window_bounds = array<i64: 512, 16>}, {pipeline_mode = #tpu.pipeline_mode<synchronous>, transform_indices = @transform_3, window_bounds = array<i64: 512, 16>}, {pipeline_mode = #tpu.pipeline_mode<synchronous>, transform_indices = @transform_4, window_bounds = array<i64: 512, 16>}, {pipeline_mode = #tpu.pipeline_mode<synchronous>, transform_indices = @transform_5, window_bounds = array<i64: 512, 16>}, {transform_indices = @transform_6, window_bounds = array<i64: 1, 1>}, {transform_indices = @transform_7, window_bounds = array<i64: 1, 16>}]} {
    %c0 = arith.constant 0 : index
    %c0_0 = arith.constant 0 : index
    %0 = vector.load %arg1[%c0, %c0_0] : memref<1x512xf32, #tpu.memory_space<vmem>>, vector<1x512xf32>
    %c0_1 = arith.constant 0 : index
    %c0_2 = arith.constant 0 : index
    %1 = vector.load %arg3[%c0_1, %c0_2] : memref<512x16xf32, #tpu.memory_space<vmem>>, vector<512x16xf32>
    %cst = arith.constant dense<0.000000e+00> : vector<1x16xf32>
    %2 = tpu.matmul %0, %1, %cst {dimension_numbers = #tpu.dot_dimension_numbers<[1], [0], [0], [1], [0, 0, 1, 1], [], []>} : vector<1x512xf32>, vector<512x16xf32>, vector<1x16xf32> -> vector<1x16xf32>
    %3 = arith.mulf %0, %0 : vector<1x512xf32>
    %cst_3 = arith.constant dense<0.000000e+00> : vector<1x16xf32>
    %4 = tpu.matmul %3, %1, %cst_3 {dimension_numbers = #tpu.dot_dimension_numbers<[1], [0], [0], [1], [0, 0, 1, 1], [], []>} : vector<1x512xf32>, vector<512x16xf32>, vector<1x16xf32> -> vector<1x16xf32>
    %c0_4 = arith.constant 0 : index
    %c0_5 = arith.constant 0 : index
    %5 = vector.load %arg4[%c0_4, %c0_5] : memref<512x16xf32, #tpu.memory_space<vmem>>, vector<512x16xf32>
    %cst_6 = arith.constant dense<0.000000e+00> : vector<1x16xf32>
    %6 = tpu.matmul %0, %5, %cst_6 {dimension_numbers = #tpu.dot_dimension_numbers<[1], [0], [0], [1], [0, 0, 1, 1], [], []>} : vector<1x512xf32>, vector<512x16xf32>, vector<1x16xf32> -> vector<1x16xf32>
    %7 = arith.mulf %2, %2 : vector<1x16xf32>
    %8 = arith.subf %4, %7 : vector<1x16xf32>
    %cst_7 = arith.constant 9.99999974E-6 : f32
    %9 = vector.broadcast %cst_7 : f32 to vector<1x16xf32>
    %10 = arith.addf %8, %9 : vector<1x16xf32>
    %11 = math.rsqrt %10 : vector<1x16xf32>
    %12 = arith.mulf %6, %11 : vector<1x16xf32>
    %c0_8 = arith.constant 0 : index
    %c0_9 = arith.constant 0 : index
    %13 = vector.load %arg2[%c0_8, %c0_9] : memref<1x512xf32, #tpu.memory_space<vmem>>, vector<1x512xf32>
    %c0_10 = arith.constant 0 : index
    %c0_11 = arith.constant 0 : index
    %14 = vector.load %arg5[%c0_10, %c0_11] : memref<512x16xf32, #tpu.memory_space<vmem>>, vector<512x16xf32>
    %cst_12 = arith.constant dense<0.000000e+00> : vector<1x16xf32>
    %15 = tpu.matmul %13, %14, %cst_12 {dimension_numbers = #tpu.dot_dimension_numbers<[1], [0], [0], [1], [0, 0, 1, 1], [], []>} : vector<1x512xf32>, vector<512x16xf32>, vector<1x16xf32> -> vector<1x16xf32>
    %16 = arith.mulf %13, %13 : vector<1x512xf32>
    %cst_13 = arith.constant dense<0.000000e+00> : vector<1x16xf32>
    %17 = tpu.matmul %16, %14, %cst_13 {dimension_numbers = #tpu.dot_dimension_numbers<[1], [0], [0], [1], [0, 0, 1, 1], [], []>} : vector<1x512xf32>, vector<512x16xf32>, vector<1x16xf32> -> vector<1x16xf32>
    %c0_14 = arith.constant 0 : index
    %c0_15 = arith.constant 0 : index
    %18 = vector.load %arg6[%c0_14, %c0_15] : memref<512x16xf32, #tpu.memory_space<vmem>>, vector<512x16xf32>
    %cst_16 = arith.constant dense<0.000000e+00> : vector<1x16xf32>
    %19 = tpu.matmul %13, %18, %cst_16 {dimension_numbers = #tpu.dot_dimension_numbers<[1], [0], [0], [1], [0, 0, 1, 1], [], []>} : vector<1x512xf32>, vector<512x16xf32>, vector<1x16xf32> -> vector<1x16xf32>
    %20 = arith.mulf %15, %15 : vector<1x16xf32>
    %21 = arith.subf %17, %20 : vector<1x16xf32>
    %cst_17 = arith.constant 9.99999974E-6 : f32
    %22 = vector.broadcast %cst_17 : f32 to vector<1x16xf32>
    %23 = arith.addf %21, %22 : vector<1x16xf32>
    %24 = math.rsqrt %23 : vector<1x16xf32>
    %25 = arith.mulf %19, %24 : vector<1x16xf32>
    %26 = arith.addf %12, %25 : vector<1x16xf32>
    %c0_18 = arith.constant 0 : index
    %c0_19 = arith.constant 0 : index
    %27 = memref.load %arg7[%c0_18, %c0_19] : memref<1x1xf32, #tpu.memory_space<smem>>
    %28 = vector.broadcast %27 : f32 to vector<1x16xf32>
    %29 = arith.addf %26, %28 : vector<1x16xf32>
    %c0_20 = arith.constant 0 : index
    %c0_21 = arith.constant 0 : index
    %30 = vector.load %arg8[%c0_20, %c0_21] : memref<1x16xf32, #tpu.memory_space<vmem>>, vector<1x16xf32>
    tpu.vector_store %arg8[%c0_20, %c0_21], %29 {strides = array<i32>} : memref<1x16xf32, #tpu.memory_space<vmem>>, vector<1x16xf32>,
    return
  }
  func.func @transform_0(%arg0: i32) -> (i32, i32) {
    %c0_i32 = arith.constant 0 : i32
    %c0_i32_0 = arith.constant 0 : i32
    return %arg0, %c0_i32 : i32, i32
  }
  func.func @transform_1(%arg0: i32) -> (i32, i32) {
    %c0_i32 = arith.constant 0 : i32
    %c0_i32_0 = arith.constant 0 : i32
    return %arg0, %c0_i32 : i32, i32
  }
  func.func @transform_2(%arg0: i32) -> (i32, i32) {
    %c0_i32 = arith.constant 0 : i32
    %c0_i32_0 = arith.constant 0 : i32
    %c0_i32_1 = arith.constant 0 : i32
    return %c0_i32, %c0_i32_0 : i32, i32
  }
  func.func @transform_3(%arg0: i32) -> (i32, i32) {
    %c0_i32 = arith.constant 0 : i32
    %c0_i32_0 = arith.constant 0 : i32
    %c0_i32_1 = arith.constant 0 : i32
    return %c0_i32, %c0_i32_0 : i32, i32
  }
  func.func @transform_4(%arg0: i32) -> (i32, i32) {
    %c0_i32 = arith.constant 0 : i32
    %c0_i32_0 = arith.constant 0 : i32
    %c0_i32_1 = arith.constant 0 : i32
    return %c0_i32, %c0_i32_0 : i32, i32
  }
  func.func @transform_5(%arg0: i32) -> (i32, i32) {
    %c0_i32 = arith.constant 0 : i32
    %c0_i32_0 = arith.constant 0 : i32
    %c0_i32_1 = arith.constant 0 : i32
    return %c0_i32, %c0_i32_0 : i32, i32
  }
  func.func @transform_6(%arg0: i32) -> (i32, i32) {
    %c0_i32 = arith.constant 0 : i32
    %c0_i32_0 = arith.constant 0 : i32
    %c0_i32_1 = arith.constant 0 : i32
    return %c0_i32, %c0_i32_0 : i32, i32
  }
  func.func @transform_7(%arg0: i32) -> (i32, i32) {
    %c0_i32 = arith.constant 0 : i32
    %c0_i32_0 = arith.constant 0 : i32
    return %arg0, %c0_i32 : i32, i32
  }
}

</mosaic_0001>

<bundles_post_ra>
// kernel: tpu_custom_call.1
= control target key start
LH: loop header
LB: loop body
LE: loop exit
PB: predicated region body
PF: predicated region fallthrough
CT: control target
= control target key end

     0   :  { %v94_v47 = vlaneseq  ;;  %s3185_s0 = inlined_call_operand.vmem [shape: f32[1,512], index: 0, kind: input, shape index: {}]   ;;  %s3186_s1 = inlined_call_operand.vmem [shape: f32[1,512], index: 1, kind: input, shape index: {}]   ;;  %s3187_s2 = inlined_call_operand.vmem [shape: f32[512,16], index: 2, kind: input, shape index: {}]   ;;  %s3188_s3 = inlined_call_operand.vmem [shape: f32[512,16], index: 3, kind: input, shape index: {}]   ;;  %s3189_s4 = inlined_call_operand.vmem [shape: f32[512,16], index: 4, kind: input, shape index: {}]   ;;  %s3190_s5 = inlined_call_operand.vmem [shape: f32[512,16], index: 5, kind: input, shape index: {}]   ;;  %s3191_s6 = inlined_call_operand.<no memory space> [shape: f32[1,1], index: 6, kind: input, shape index: {}]   ;;  %s3192_s7 = inlined_call_operand.hbm [shape: f32[1,16], index: 7, kind: output, shape index: {}]  }
   0x1   :  { %v45_v0 = vld [vmem:[%s3187_s2 + $0x80] sm:$0xff]  ;;  %v46_v1 = vld [vmem:[%s3187_s2 + $0x88] sm:$0xff]  ;;  %v47_v11 = vld [vmem:[%s3187_s2 + $0x90] sm:$0xff] }
   0x2   :  { %v77_v2 = vld [vmem:[%s3187_s2 + $0x180] sm:$0xff]  ;;  %v2125_v3 = vpack.c.bf16 %v46_v1, %v45_v0  ;;  %v78_v4 = vld [vmem:[%s3187_s2 + $0x188] sm:$0xff]  ;;  %v48_v13 = vld [vmem:[%s3187_s2 + $0x98] sm:$0xff]  ;;  %v95_v61 = vshrl.u32 %v94_v47, 7 }
   0x3   :  { %v29_v5 = vld [vmem:[%s3187_s2] sm:$0xff]  ;;  %v30_v6 = vld [vmem:[%s3187_s2 + $0x8] sm:$0xff]  ;;  %v2136_v7 = vpack.c.bf16 %v78_v4, %v77_v2  ;;  %v79_v14 = vld [vmem:[%s3187_s2 + $0x190] sm:$0xff]  ;;  %v2163_v16 = vpack.c.bf16 %v48_v13, %v47_v11 }
   0x4   :  { %v2138_v8 = vpack.c.bf16 %v30_v6, %v29_v5  ;;  %v61_v9 = vld [vmem:[%s3187_s2 + $0x100] sm:$0xff]  ;;  %v62_v10 = vld [vmem:[%s3187_s2 + $0x108] sm:$0xff]  ;;  %1663 = vmatprep.subr.bf16.mxu0 %v2125_v3  ;;  %v80_v15 = vld [vmem:[%s3187_s2 + $0x198] sm:$0xff] }
   0x5   :  { %v2150_v12 = vpack.c.bf16 %v62_v10, %v61_v9  ;;  %1695 = vmatprep.subr.bf16.mxu1 %v2136_v7  ;;  %v2165_v17 = vpack.c.bf16 %v80_v15, %v79_v14  ;;  %v31_v18 = vld [vmem:[%s3187_s2 + $0x10] sm:$0xff]  ;;  %v32_v19 = vld [vmem:[%s3187_s2 + $0x18] sm:$0xff]  ;;  %v49_v23 = vld [vmem:[%s3187_s2 + $0xa0] sm:$0xff]  ;;  %v2328_v14 = vsub.s32 1, %v95_v61  ;;  %v2330_v15 = vsub.s32 3, %v95_v61 }
   0x6   :  { %1665 = vmatpush3.bf16.msra.mxu0 %v2138_v8  ;;  %v63_v20 = vld [vmem:[%s3187_s2 + $0x110] sm:$0xff]  ;;  %v2177_v21 = vpack.c.bf16 %v32_v19, %v31_v18  ;;  %v64_v22 = vld [vmem:[%s3187_s2 + $0x118] sm:$0xff]  ;;  %v50_v24 = vld [vmem:[%s3187_s2 + $0xa8] sm:$0xff] }
   0x7   :  { %1697 = vmatpush3.bf16.msra.mxu1 %v2150_v12  ;;  %1667 = vmatprep.subr.bf16.mxu0 %v2163_v16  ;;  %v2190_v25 = vpack.c.bf16 %v64_v22, %v63_v20  ;;  %v2192_v26 = vpack.c.bf16 %v50_v24, %v49_v23  ;;  %v81_v27 = vld [vmem:[%s3187_s2 + $0x1a0] sm:$0xff]  ;;  %v82_v28 = vld [vmem:[%s3187_s2 + $0x1a8] sm:$0xff]  ;;  %v51_v35 = vld [vmem:[%s3187_s2 + $0xb0] sm:$0xff] }
   0x8   :  { %1699 = vmatprep.subr.bf16.mxu1 %v2165_v17  ;;  %v33_v29 = vld [vmem:[%s3187_s2 + $0x20] sm:$0xff]  ;;  %v2203_v30 = vpack.c.bf16 %v82_v28, %v81_v27  ;;  %v34_v31 = vld [vmem:[%s3187_s2 + $0x28] sm:$0xff]  ;;  %v52_v36 = vld [vmem:[%s3187_s2 + $0xb8] sm:$0xff] }
   0x9   :  { %v65_v32 = vld [vmem:[%s3187_s2 + $0x120] sm:$0xff]  ;;  %v66_v33 = vld [vmem:[%s3187_s2 + $0x128] sm:$0xff]  ;;  %v2215_v34 = vpack.c.bf16 %v34_v31, %v33_v29  ;;  %v83_v37 = vld [vmem:[%s3187_s2 + $0x1b0] sm:$0xff]  ;;  %v2230_v39 = vpack.c.bf16 %v52_v36, %v51_v35 }
   0xa   :  { %1669 = vmatpush3.bf16.msra.mxu0 %v2177_v21  ;;  %v2228_v38 = vpack.c.bf16 %v66_v33, %v65_v32  ;;  %v84_v40 = vld [vmem:[%s3187_s2 + $0x1b8] sm:$0xff]  ;;  %v35_v41 = vld [vmem:[%s3187_s2 + $0x30] sm:$0xff]  ;;  %v53_v46 = vld [vmem:[%s3187_s2 + $0xc0] sm:$0xff] }
   0xb   :  { %1701 = vmatpush3.bf16.msra.mxu1 %v2190_v25  ;;  %1671 = vmatprep.subr.bf16.mxu0 %v2192_v26  ;;  %v36_v42 = vld [vmem:[%s3187_s2 + $0x38] sm:$0xff]  ;;  %v2242_v43 = vpack.c.bf16 %v84_v40, %v83_v37  ;;  %v67_v44 = vld [vmem:[%s3187_s2 + $0x130] sm:$0xff]  ;;  %v54_v48 = vld [vmem:[%s3187_s2 + $0xc8] sm:$0xff] }
   0xc   :  { %1703 = vmatprep.subr.bf16.mxu1 %v2203_v30  ;;  %v68_v45 = vld [vmem:[%s3187_s2 + $0x138] sm:$0xff]  ;;  %v85_v49 = vld [vmem:[%s3187_s2 + $0x1c0] sm:$0xff]  ;;  %v86_v50 = vld [vmem:[%s3187_s2 + $0x1c8] sm:$0xff]  ;;  %v2263_v51 = vpack.c.bf16 %v36_v42, %v35_v41  ;;  %v2269_v53 = vpack.c.bf16 %v54_v48, %v53_v46 }
   0xd   :  { %v2267_v52 = vpack.c.bf16 %v68_v45, %v67_v44  ;;  %v37_v54 = vld [vmem:[%s3187_s2 + $0x40] sm:$0xff]  ;;  %v38_v55 = vld [vmem:[%s3187_s2 + $0x48] sm:$0xff]  ;;  %v2281_v57 = vpack.c.bf16 %v86_v50, %v85_v49  ;;  %v55_v59 = vld [vmem:[%s3187_s2 + $0xd0] sm:$0xff] }
   0xe   :  { %1673 = vmatpush3.bf16.msra.mxu0 %v2215_v34  ;;  %v69_v56 = vld [vmem:[%s3187_s2 + $0x140] sm:$0xff]  ;;  %v70_v58 = vld [vmem:[%s3187_s2 + $0x148] sm:$0xff]  ;;  %v56_v60 = vld [vmem:[%s3187_s2 + $0xd8] sm:$0xff]  ;;  %v2299_v0 = vpack.c.bf16 %v38_v55, %v37_v54  ;;  %v2401_v54 = vsub.s32 0, %v95_v61 }
   0xf   :  { %1705 = vmatpush3.bf16.msra.mxu1 %v2228_v38  ;;  %1675 = vmatprep.subr.bf16.mxu0 %v2230_v39  ;;  %v87_v62 = vld [vmem:[%s3187_s2 + $0x1d0] sm:$0xff]  ;;  %v88_v63 = vld [vmem:[%s3187_s2 + $0x1d8] sm:$0xff]  ;;  %v2303_v1 = vpack.c.bf16 %v70_v58, %v69_v56  ;;  %v2305_v2 = vpack.c.bf16 %v56_v60, %v55_v59  ;;  %v57_v11 = vld [vmem:[%s3187_s2 + $0xe0] sm:$0xff]  ;;  %v2403_v56 = vsub.s32 2, %v95_v61 }
  0x10   :  { %1707 = vmatprep.subr.bf16.mxu1 %v2242_v43  ;;  %v39_v4 = vld [vmem:[%s3187_s2 + $0x50] sm:$0xff]  ;;  %v40_v5 = vld [vmem:[%s3187_s2 + $0x58] sm:$0xff]  ;;  %v2317_v9 = vpack.c.bf16 %v88_v63, %v87_v62  ;;  %v58_v13 = vld [vmem:[%s3187_s2 + $0xe8] sm:$0xff] }
  0x11   :  { %v71_v6 = vld [vmem:[%s3187_s2 + $0x150] sm:$0xff]  ;;  %v72_v10 = vld [vmem:[%s3187_s2 + $0x158] sm:$0xff]  ;;  %v89_v18 = vld [vmem:[%s3187_s2 + $0x1e0] sm:$0xff]  ;;  %v2339_v20 = vpack.c.bf16 %v40_v5, %v39_v4  ;;  %v2348_v24 = vpack.c.bf16 %v58_v13, %v57_v11 }
  0x12   :  { %1677 = vmatpush3.bf16.msra.mxu0 %v2263_v51  ;;  %v90_v19 = vld [vmem:[%s3187_s2 + $0x1e8] sm:$0xff]  ;;  %v41_v22 = vld [vmem:[%s3187_s2 + $0x60] sm:$0xff]  ;;  %v2346_v23 = vpack.c.bf16 %v72_v10, %v71_v6  ;;  %v59_v33 = vld [vmem:[%s3187_s2 + $0xf0] sm:$0xff] }
  0x13   :  { %1709 = vmatpush3.bf16.msra.mxu1 %v2267_v52  ;;  %1679 = vmatprep.subr.bf16.mxu0 %v2269_v53  ;;  %v42_v27 = vld [vmem:[%s3187_s2 + $0x68] sm:$0xff]  ;;  %v73_v28 = vld [vmem:[%s3187_s2 + $0x160] sm:$0xff]  ;;  %v2360_v31 = vpack.c.bf16 %v90_v19, %v89_v18  ;;  %v60_v35 = vld [vmem:[%s3187_s2 + $0xf8] sm:$0xff] }
  0x14   :  { %1711 = vmatprep.subr.bf16.mxu1 %v2281_v57  ;;  %v28_v29 = vld [vmem:[%s3185_s0] sm:$0xf]  ;;  %v74_v32 = vld [vmem:[%s3187_s2 + $0x168] sm:$0xff]  ;;  %v91_v40 = vld [vmem:[%s3187_s2 + $0x1f0] sm:$0xff]  ;;  %v1688_v42 = vpack.c.bf16 %v42_v27, %v41_v22  ;;  %v1690_v45 = vpack.c.bf16 %v60_v35, %v59_v33 }
  0x15   :  { %v2372_v36 = vrot.slane %v28_v29, %v2328_v14  ;;  %v2375_v37 = vrot.slane %v28_v29, %v2330_v15  ;;  %v92_v41 = vld [vmem:[%s3187_s2 + $0x1f8] sm:$0xff]  ;;  %v1720_v44 = vpack.c.bf16 %v74_v32, %v73_v28  ;;  %v43_v46 = vld [vmem:[%s3187_s2 + $0x70] sm:$0xff]  ;;  %v2405_v59 = vmul.f32 %v28_v29, %v28_v29  ;;  %v437_v10 = vld [vmem:[%s3188_s3 + $0xa8] sm:$0xff] }
  0x16   :  { %1681 = vmatpush3.bf16.msra.mxu0 %v2299_v0  ;;  %v44_v47 = vld [vmem:[%s3187_s2 + $0x78] sm:$0xff]  ;;  %v1722_v48 = vpack.c.bf16 %v92_v41, %v91_v40  ;;  %v75_v49 = vld [vmem:[%s3187_s2 + $0x170] sm:$0xff]  ;;  %v2408_v60 = vrot.slane %v28_v29, %v2401_v54  ;;  %v2411_v62 = vrot.slane %v28_v29, %v2403_v56  ;;  %v468_v11 = vld [vmem:[%s3188_s3 + $0x1a0] sm:$0xff] }
  0x17   :  { %1713 = vmatpush3.bf16.msra.mxu1 %v2303_v1  ;;  %1683 = vmatprep.subr.bf16.mxu0 %v2305_v2  ;;  %v76_v50 = vld [vmem:[%s3187_s2 + $0x178] sm:$0xff]  ;;  %v1692_v55 = vpack.c.bf16 %v44_v47, %v43_v46  ;;  %v263_v61 = vrot.slane %v2405_v59, %v2328_v14  ;;  %v271_v63 = vrot.slane %v2405_v59, %v2330_v15  ;;  %v450_v4 = vld [vmem:[%s3188_s3 + $0x110] sm:$0xff]  ;;  %v469_v13 = vld [vmem:[%s3188_s3 + $0x1a8] sm:$0xff] }
  0x18   :  { %1715 = vmatprep.subr.bf16.mxu1 %v2317_v9  ;;  %178 = vmatprep.mubr.f32.mxu0 %v2372_v36  ;;  %v1724_v58 = vpack.c.bf16 %v76_v50, %v75_v49  ;;  %v451_v6 = vld [vmem:[%s3188_s3 + $0x118] sm:$0xff]  ;;  %v420_v22 = vld [vmem:[%s3188_s3 + $0x20] sm:$0xff]  ;;  %v1830_v27 = vpack.c.bf16 %v469_v13, %v468_v11  ;;  %v453_v28 = vld [vmem:[%s3188_s3 + $0x128] sm:$0xff] }
  0x19   :  { %248 = vmatprep.mubr.f32.mxu1 %v2375_v37  ;;  %v1828_v19 = vpack.c.bf16 %v451_v6, %v450_v4  ;;  %v438_v29 = vld [vmem:[%s3188_s3 + $0xb0] sm:$0xff]  ;;  %v471_v33 = vld [vmem:[%s3188_s3 + $0x1b8] sm:$0xff]  ;;  %v440_v46 = vld [vmem:[%s3188_s3 + $0xc0] sm:$0xff] }
  0x1a   :  { %1685 = vmatpush3.bf16.msra.mxu0 %v2339_v20  ;;  %v470_v32 = vld [vmem:[%s3188_s3 + $0x1b0] sm:$0xff]  ;;  %v441_v47 = vld [vmem:[%s3188_s3 + $0xc8] sm:$0xff]  ;;  %v460_v6 = vld [vmem:[%s3188_s3 + $0x160] sm:$0xff] }
  0x1b   :  { %1717 = vmatpush3.bf16.msra.mxu1 %v2346_v23  ;;  %1687 = vmatprep.subr.bf16.mxu0 %v2348_v24  ;;  %v473_v49 = vld [vmem:[%s3188_s3 + $0x1c8] sm:$0xff]  ;;  %v446_v11 = vld [vmem:[%s3188_s3 + $0xf0] sm:$0xff]  ;;  %v447_v13 = vld [vmem:[%s3188_s3 + $0xf8] sm:$0xff] }
  0x1c   :  { %1719 = vmatprep.subr.bf16.mxu1 %v2360_v31 }
  0x1e   :  { %1689 = vmatpush3.bf16.msra.mxu0 %v1688_v42 }
  0x1f   :  { %1721 = vmatpush3.bf16.msra.mxu1 %v1720_v44  ;;  %1691 = vmatprep.subr.bf16.mxu0 %v1690_v45 }
  0x20   :  { %1723 = vmatprep.subr.bf16.mxu1 %v1722_v48 }
  0x22   :  { %1693 = vmatpush3.bf16.msra.mxu0 %v1692_v55 }
  0x23   :  { %1725 = vmatpush3.bf16.msra.mxu1 %v1724_v58  ;;  %1727 = vmatprep.subr.bf16.mxu0 %v2125_v3  ;;  %v432_v3 = vld [vmem:[%s3188_s3 + $0x80] sm:$0xff] }
  0x24   :  { %1759 = vmatprep.subr.bf16.mxu1 %v2136_v7  ;;  %v433_v7 = vld [vmem:[%s3188_s3 + $0x88] sm:$0xff] }
  0x25   :  { %179 = vmatmul.mubr.f32.vlgmr.msra.gmra.mrb[0].mxu0 %v2408_v60 }
  0x26   :  { %249 = vmatmul.mubr.f32.vlgmr.msra.gmra.mrb[0].mxu1 %v2411_v62  ;;  %1729 = vmatpush3.bf16.msra.mxu0 %v2138_v8  ;;  %v464_v8 = vld [vmem:[%s3188_s3 + $0x180] sm:$0xff] }
  0x27   :  { %1761 = vmatpush3.bf16.msra.mxu1 %v2150_v12  ;;  %1731 = vmatprep.subr.bf16.mxu0 %v2163_v16  ;;  %v465_v12 = vld [vmem:[%s3188_s3 + $0x188] sm:$0xff]  ;;  %v1790_v16 = vpack.c.bf16 %v433_v7, %v432_v3 }
  0x28   :  { %1763 = vmatprep.subr.bf16.mxu1 %v2165_v17  ;;  %340 = vmatprep.mubr.f32.mxu0 %v263_v61  ;;  %v416_v17 = vld [vmem:[%s3188_s3] sm:$0xff]  ;;  %v425_v61 = vld [vmem:[%s3188_s3 + $0x48] sm:$0xff] }
  0x29   :  { %410 = vmatprep.mubr.f32.mxu1 %v271_v63  ;;  %v456_v63 = vld [vmem:[%s3188_s3 + $0x140] sm:$0xff]  ;;  %v457_v7 = vld [vmem:[%s3188_s3 + $0x148] sm:$0xff] }
  0x2a   :  { %1733 = vmatpush3.bf16.msra.mxu0 %v2177_v21  ;;  %v417_v21 = vld [vmem:[%s3188_s3 + $0x8] sm:$0xff] }
  0x2b   :  { %1765 = vmatpush3.bf16.msra.mxu1 %v2190_v25  ;;  %1735 = vmatprep.subr.bf16.mxu0 %v2192_v26  ;;  %v448_v25 = vld [vmem:[%s3188_s3 + $0x100] sm:$0xff]  ;;  %v1822_v26 = vpack.c.bf16 %v465_v12, %v464_v8  ;;  %v442_v8 = vld [vmem:[%s3188_s3 + $0xd0] sm:$0xff]  ;;  %v443_v12 = vld [vmem:[%s3188_s3 + $0xd8] sm:$0xff] }
  0x2c   :  { %1767 = vmatprep.subr.bf16.mxu1 %v2203_v30  ;;  %v449_v30 = vld [vmem:[%s3188_s3 + $0x108] sm:$0xff] }
  0x2e   :  { %1737 = vmatpush3.bf16.msra.mxu0 %v2215_v34  ;;  %v434_v34 = vld [vmem:[%s3188_s3 + $0x90] sm:$0xff] }
  0x2f   :  { %1769 = vmatpush3.bf16.msra.mxu1 %v2228_v38  ;;  %1739 = vmatprep.subr.bf16.mxu0 %v2230_v39  ;;  %v435_v38 = vld [vmem:[%s3188_s3 + $0x98] sm:$0xff]  ;;  %v259_v39 = vrot.slane %v2405_v59, %v2401_v54 }
  0x30   :  { %1771 = vmatprep.subr.bf16.mxu1 %v2242_v43  ;;  %v466_v43 = vld [vmem:[%s3188_s3 + $0x190] sm:$0xff] }
  0x32   :  { %1741 = vmatpush3.bf16.msra.mxu0 %v2263_v51  ;;  %v467_v51 = vld [vmem:[%s3188_s3 + $0x198] sm:$0xff] }
  0x33   :  { %1773 = vmatpush3.bf16.msra.mxu1 %v2267_v52  ;;  %1743 = vmatprep.subr.bf16.mxu0 %v2269_v53  ;;  %v267_v52 = vrot.slane %v2405_v59, %v2403_v56  ;;  %v1792_v53 = vpack.c.bf16 %v417_v21, %v416_v17  ;;  %v1826_v5 = vpack.c.bf16 %v467_v51, %v466_v43  ;;  %v424_v59 = vld [vmem:[%s3188_s3 + $0x40] sm:$0xff]  ;;  %v475_v17 = vld [vmem:[%s3188_s3 + $0x1d8] sm:$0xff] }
  0x34   :  { %1775 = vmatprep.subr.bf16.mxu1 %v2281_v57  ;;  %v1824_v57 = vpack.c.bf16 %v449_v30, %v448_v25  ;;  %v1808_v21 = vpack.c.bf16 %v425_v61, %v424_v59  ;;  %v1840_v25 = vpack.c.bf16 %v457_v7, %v456_v63  ;;  %v426_v30 = vld [vmem:[%s3188_s3 + $0x50] sm:$0xff]  ;;  %v459_v43 = vld [vmem:[%s3188_s3 + $0x158] sm:$0xff]  ;;  %v444_v51 = vld [vmem:[%s3188_s3 + $0xe0] sm:$0xff] }
  0x36   :  { %1745 = vmatpush3.bf16.msra.mxu0 %v2299_v0  ;;  %v1794_v0 = vpack.c.bf16 %v435_v38, %v434_v34  ;;  %v427_v34 = vld [vmem:[%s3188_s3 + $0x58] sm:$0xff]  ;;  %v458_v38 = vld [vmem:[%s3188_s3 + $0x150] sm:$0xff] }
  0x37   :  { %1777 = vmatpush3.bf16.msra.mxu1 %v2303_v1  ;;  %1747 = vmatprep.subr.bf16.mxu0 %v2305_v2  ;;  %v418_v1 = vld [vmem:[%s3188_s3 + $0x10] sm:$0xff]  ;;  %v419_v2 = vld [vmem:[%s3188_s3 + $0x18] sm:$0xff] }
  0x38   :  { %1779 = vmatprep.subr.bf16.mxu1 %v2317_v9  ;;  %v436_v9 = vld [vmem:[%s3188_s3 + $0xa0] sm:$0xff]  ;;  %v1796_v18 = vpack.c.bf16 %v419_v2, %v418_v1  ;;  %v1844_v2 = vpack.c.bf16 %v459_v43, %v458_v38 }
  0x39   :  { %v428_v1 = vld [vmem:[%s3188_s3 + $0x60] sm:$0xff] }
  0x3a   :  { %1749 = vmatpush3.bf16.msra.mxu0 %v2339_v20  ;;  %v1798_v20 = vpack.c.bf16 %v437_v10, %v436_v9  ;;  %v461_v9 = vld [vmem:[%s3188_s3 + $0x168] sm:$0xff] }
  0x3b   :  { %1781 = vmatpush3.bf16.msra.mxu1 %v2346_v23  ;;  %1751 = vmatprep.subr.bf16.mxu0 %v2348_v24  ;;  %v421_v23 = vld [vmem:[%s3188_s3 + $0x28] sm:$0xff]  ;;  %v452_v24 = vld [vmem:[%s3188_s3 + $0x120] sm:$0xff] }
  0x3c   :  { %1783 = vmatprep.subr.bf16.mxu1 %v2360_v31  ;;  %v439_v31 = vld [vmem:[%s3188_s3 + $0xb8] sm:$0xff]  ;;  %v1800_v35 = vpack.c.bf16 %v421_v23, %v420_v22  ;;  %v1832_v40 = vpack.c.bf16 %v453_v28, %v452_v24 }
  0x3d   :  { %v1802_v41 = vpack.c.bf16 %v439_v31, %v438_v29 }
  0x3e   :  { %1753 = vmatpush3.bf16.msra.mxu0 %v1688_v42  ;;  %v423_v42 = vld [vmem:[%s3188_s3 + $0x38] sm:$0xff] }
  0x3f   :  { %1785 = vmatpush3.bf16.msra.mxu1 %v1720_v44  ;;  %1755 = vmatprep.subr.bf16.mxu0 %v1690_v45  ;;  %v454_v44 = vld [vmem:[%s3188_s3 + $0x130] sm:$0xff]  ;;  %v455_v45 = vld [vmem:[%s3188_s3 + $0x138] sm:$0xff] }
  0x40   :  { %1787 = vmatprep.subr.bf16.mxu1 %v1722_v48  ;;  %v472_v48 = vld [vmem:[%s3188_s3 + $0x1c0] sm:$0xff] }
  0x41   :  { %v1838_v3 = vpack.c.bf16 %v473_v49, %v472_v48 }
  0x42   :  { %1757 = vmatpush3.bf16.msra.mxu0 %v1692_v55  ;;  %v1836_v55 = vpack.c.bf16 %v455_v45, %v454_v44 }
  0x43   :  { %1789 = vmatpush3.bf16.msra.mxu1 %v1724_v58  ;;  %1791 = vmatprep.subr.bf16.mxu0 %v1790_v16  ;;  %v1806_v58 = vpack.c.bf16 %v441_v47, %v440_v46  ;;  %v474_v16 = vld [vmem:[%s3188_s3 + $0x1d0] sm:$0xff] }
  0x44   :  { %1823 = vmatprep.subr.bf16.mxu1 %v1822_v26  ;;  %v1810_v26 = vpack.c.bf16 %v443_v12, %v442_v8 }
  0x45   :  { %341 = vmatmul.mubr.f32.vlgmr.msra.gmra.mrb[2].mxu0 %v259_v39  ;;  %v1842_v39 = vpack.c.bf16 %v475_v17, %v474_v16 }
  0x46   :  { %411 = vmatmul.mubr.f32.vlgmr.msra.gmra.mrb[2].mxu1 %v267_v52  ;;  %1793 = vmatpush3.bf16.msra.mxu0 %v1792_v53  ;;  %v445_v52 = vld [vmem:[%s3188_s3 + $0xe8] sm:$0xff]  ;;  %v476_v53 = vld [vmem:[%s3188_s3 + $0x1e0] sm:$0xff] }
  0x47   :  { %1825 = vmatpush3.bf16.msra.mxu1 %v1824_v57  ;;  %1795 = vmatprep.subr.bf16.mxu0 %v1794_v0  ;;  %v477_v57 = vld [vmem:[%s3188_s3 + $0x1e8] sm:$0xff]  ;;  %v1812_v0 = vpack.c.bf16 %v427_v34, %v426_v30  ;;  %v1814_v4 = vpack.c.bf16 %v445_v52, %v444_v51 }
  0x48   :  { %1827 = vmatprep.subr.bf16.mxu1 %v1826_v5  ;;  %544 = vmatprep.mubr.f32.mxu0 %v2372_v36  ;;  %v422_v36 = vld [vmem:[%s3188_s3 + $0x30] sm:$0xff]  ;;  %v429_v5 = vld [vmem:[%s3188_s3 + $0x68] sm:$0xff]  ;;  %v1846_v10 = vpack.c.bf16 %v477_v57, %v476_v53 }
  0x49   :  { %614 = vmatprep.mubr.f32.mxu1 %v2375_v37  ;;  %v1834_v37 = vpack.c.bf16 %v471_v33, %v470_v32  ;;  %v1804_v50 = vpack.c.bf16 %v423_v42, %v422_v36 }
  0x4a   :  { %1797 = vmatpush3.bf16.msra.mxu0 %v1796_v18 }
  0x4b   :  { %1829 = vmatpush3.bf16.msra.mxu1 %v1828_v19  ;;  %1799 = vmatprep.subr.bf16.mxu0 %v1798_v20 }
  0x4c   :  { %1831 = vmatprep.subr.bf16.mxu1 %v1830_v27 }
  0x4e   :  { %1801 = vmatpush3.bf16.msra.mxu0 %v1800_v35 }
  0x4f   :  { %1833 = vmatpush3.bf16.msra.mxu1 %v1832_v40  ;;  %1803 = vmatprep.subr.bf16.mxu0 %v1802_v41 }
  0x50   :  { %1835 = vmatprep.subr.bf16.mxu1 %v1834_v37 }
  0x52   :  { %1805 = vmatpush3.bf16.msra.mxu0 %v1804_v50 }
  0x53   :  { %1837 = vmatpush3.bf16.msra.mxu1 %v1836_v55  ;;  %1807 = vmatprep.subr.bf16.mxu0 %v1806_v58 }
  0x54   :  { %1839 = vmatprep.subr.bf16.mxu1 %v1838_v3 }
  0x56   :  { %1809 = vmatpush3.bf16.msra.mxu0 %v1808_v21 }
  0x57   :  { %1841 = vmatpush3.bf16.msra.mxu1 %v1840_v25  ;;  %1811 = vmatprep.subr.bf16.mxu0 %v1810_v26 }
  0x58   :  { %1843 = vmatprep.subr.bf16.mxu1 %v1842_v39 }
  0x59   :  { %13 = vsyncpa [#allocation4], 0  ;;  %v478_v18 = vld [vmem:[%s3188_s3 + $0x1f0] sm:$0xff]  ;;  %v479_v19 = vld [vmem:[%s3188_s3 + $0x1f8] sm:$0xff]  ;;  %v1816_v20 = vpack.c.bf16 %v429_v5, %v428_v1  ;;  %v1848_v22 = vpack.c.bf16 %v461_v9, %v460_v6  ;;  %v1818_v23 = vpack.c.bf16 %v447_v13, %v446_v11  ;;  %s2075_s0 = smov [#allocation3]   ;;  %vm1226_vm0 = vcmask 122880  }
  0x5a   :  { %1813 = vmatpush3.bf16.msra.mxu0 %v1812_v0  ;;  %v430_v24 = vld [vmem:[%s3188_s3 + $0x70] sm:$0xff]  ;;  %v431_v27 = vld [vmem:[%s3188_s3 + $0x78] sm:$0xff]  ;;  %v1850_v29 = vpack.c.bf16 %v479_v19, %v478_v18  ;;  %v642_v32 = vld [vmem:[%s3189_s4 + $0x80] sm:$0xff]  ;;  %s1234_s27 = sshll.u32 %s2075_s0, 4  ;;  %s1235_s27 = int_to_ptr.vmem [resolvable:$true] %s1234_s27 }
  0x5b   :  { %1845 = vmatpush3.bf16.msra.mxu1 %v1844_v2  ;;  %1815 = vmatprep.subr.bf16.mxu0 %v1814_v4  ;;  %v462_v28 = vld [vmem:[%s3188_s3 + $0x170] sm:$0xff]  ;;  %v463_v31 = vld [vmem:[%s3188_s3 + $0x178] sm:$0xff]  ;;  %v643_v33 = vld [vmem:[%s3189_s4 + $0x88] sm:$0xff]  ;;  %v1820_v41 = vpack.c.bf16 %v431_v27, %v430_v24  ;;  %s2051_s28 = scalar_lea.vmem %s1235_s27, 16  ;;  %s2055_s29 = scalar_lea.vmem %s1235_s27, 32 }
  0x5c   :  { %1847 = vmatprep.subr.bf16.mxu1 %v1846_v10  ;;  %v674_v35 = vld [vmem:[%s3189_s4 + $0x180] sm:$0xff]  ;;  %v675_v40 = vld [vmem:[%s3189_s4 + $0x188] sm:$0xff]  ;;  %v1852_v36 = vpack.c.bf16 %v463_v31, %v462_v28  ;;  %v2655_v42 = vpack.c.bf16 %v643_v33, %v642_v32  ;;  %v644_v48 = vld [vmem:[%s3189_s4 + $0x90] sm:$0xff]  ;;  %p2052_p0 = scmp.ne.s32.totalorder %s1235_s27, %s2051_s28  ;;  %p2056_p1 = scmp.lt.s32.totalorder %s1235_s27, %s1235_s27 }
  0x5d   :  { %v626_v44 = vld [vmem:[%s3189_s4] sm:$0xff]  ;;  %v627_v37 = vld [vmem:[%s3189_s4 + $0x8] sm:$0xff]  ;;  %v2666_v46 = vpack.c.bf16 %v675_v40, %v674_v35  ;;  %v645_v49 = vld [vmem:[%s3189_s4 + $0x98] sm:$0xff]  ;;  %p2057_p2 = scmp.lt.s32.totalorder %s2055_s29, %s2051_s28 }
  0x5e   :  { %1817 = vmatpush3.bf16.msra.mxu0 %v1816_v20  ;;  %v658_v45 = vld [vmem:[%s3189_s4 + $0x100] sm:$0xff]  ;;  %v659_v47 = vld [vmem:[%s3189_s4 + $0x108] sm:$0xff]  ;;  %v676_v50 = vld [vmem:[%s3189_s4 + $0x190] sm:$0xff]  ;;  %v2688_v59 = vpack.c.bf16 %v627_v37, %v626_v44  ;;  %v2693_v63 = vpack.c.bf16 %v645_v49, %v644_v48 }
  0x5f   :  { %1849 = vmatpush3.bf16.msra.mxu1 %v1848_v22  ;;  %1819 = vmatprep.subr.bf16.mxu0 %v1818_v23  ;;  %v677_v55 = vld [vmem:[%s3189_s4 + $0x198] sm:$0xff]  ;;  %v2686_v58 = vld [vmem:[%s3186_s1] sm:$0xf]  ;;  %v2691_v61 = vpack.c.bf16 %v659_v47, %v658_v45  ;;  %v628_v3 = vld [vmem:[%s3189_s4 + $0x10] sm:$0xff]  ;;  %p2058_p3 = por %p2057_p2, %p2056_p1 }
  0x60   :  { %1851 = vmatprep.subr.bf16.mxu1 %v1850_v29  ;;  %v629_v7 = vld [vmem:[%s3189_s4 + $0x18] sm:$0xff]  ;;  %v660_v8 = vld [vmem:[%s3189_s4 + $0x110] sm:$0xff]  ;;  %v2705_v12 = vpack.c.bf16 %v677_v55, %v676_v50  ;;  %v646_v17 = vld [vmem:[%s3189_s4 + $0xa0] sm:$0xff]  ;;  %v2718_v25 = vrot.slane %v2686_v58, %v2328_v14  ;;  %v2729_v34 = vrot.slane %v2686_v58, %v2330_v15 }
  0x61   :  { %v661_v16 = vld [vmem:[%s3189_s4 + $0x118] sm:$0xff]  ;;  %v647_v21 = vld [vmem:[%s3189_s4 + $0xa8] sm:$0xff]  ;;  %v678_v26 = vld [vmem:[%s3189_s4 + $0x1a0] sm:$0xff]  ;;  %v2733_v38 = vpack.c.bf16 %v629_v7, %v628_v3  ;;  %p2059_p4 = pnand %p2058_p3, %p2052_p0 }
  0x62   :  { %1821 = vmatpush3.bf16.msra.mxu0 %v1820_v41  ;;  %v679_v30 = vld [vmem:[%s3189_s4 + $0x1a8] sm:$0xff]  ;;  %v2739_v39 = vpack.c.bf16 %v647_v21, %v646_v17  ;;  %v630_v43 = vld [vmem:[%s3189_s4 + $0x20] sm:$0xff]  ;;  %v648_v57 = vld [vmem:[%s3189_s4 + $0xb0] sm:$0xff] }
  0x63   :  { %1853 = vmatpush3.bf16.msra.mxu1 %v1852_v36  ;;  %1855 = vmatprep.subr.bf16.mxu0 %v2655_v42  ;;  %v662_v51 = vld [vmem:[%s3189_s4 + $0x120] sm:$0xff]  ;;  %v2751_v52 = vpack.c.bf16 %v679_v30, %v678_v26  ;;  %v663_v53 = vld [vmem:[%s3189_s4 + $0x128] sm:$0xff]  ;;  %v649_v0 = vld [vmem:[%s3189_s4 + $0xb8] sm:$0xff] }
  0x64   :  { %1887 = vmatprep.subr.bf16.mxu1 %v2666_v46  ;;  %v680_v1 = vld [vmem:[%s3189_s4 + $0x1b0] sm:$0xff]  ;;  %v681_v2 = vld [vmem:[%s3189_s4 + $0x1b8] sm:$0xff]  ;;  %v2775_v5 = vpack.c.bf16 %v663_v53, %v662_v51  ;;  %v2777_v6 = vpack.c.bf16 %v649_v0, %v648_v57  ;;  %v650_v19 = vld [vmem:[%s3189_s4 + $0xc0] sm:$0xff] }
  0x65   :  { %545 = vmatmul.mubr.f32.vlgmr.msra.gmra.mrb[4].mxu0 %v2408_v60  ;;  %v2737_v60 = vpack.c.bf16 %v661_v16, %v660_v8  ;;  %v632_v9 = vld [vmem:[%s3189_s4 + $0x30] sm:$0xff]  ;;  %v633_v10 = vld [vmem:[%s3189_s4 + $0x38] sm:$0xff]  ;;  %v2789_v13 = vpack.c.bf16 %v681_v2, %v680_v1  ;;  %v651_v20 = vld [vmem:[%s3189_s4 + $0xc8] sm:$0xff] }
  0x66   :  { %615 = vmatmul.mubr.f32.vlgmr.msra.gmra.mrb[4].mxu1 %v2411_v62  ;;  %1857 = vmatpush3.bf16.msra.mxu0 %v2688_v59  ;;  %v631_v62 = vld [vmem:[%s3189_s4 + $0x28] sm:$0xff]  ;;  %v664_v11 = vld [vmem:[%s3189_s4 + $0x130] sm:$0xff]  ;;  %v665_v18 = vld [vmem:[%s3189_s4 + $0x138] sm:$0xff]  ;;  %v2807_v24 = vpack.c.bf16 %v633_v10, %v632_v9  ;;  %v2813_v28 = vpack.c.bf16 %v651_v20, %v650_v19 }
  0x67   :  { %1889 = vmatpush3.bf16.msra.mxu1 %v2691_v61  ;;  %1859 = vmatprep.subr.bf16.mxu0 %v2693_v63  ;;  %v2771_v4 = vpack.c.bf16 %v631_v62, %v630_v43  ;;  %v682_v22 = vld [vmem:[%s3189_s4 + $0x1c0] sm:$0xff]  ;;  %v683_v23 = vld [vmem:[%s3189_s4 + $0x1c8] sm:$0xff]  ;;  %v2811_v27 = vpack.c.bf16 %v665_v18, %v664_v11  ;;  %v652_v40 = vld [vmem:[%s3189_s4 + $0xd0] sm:$0xff] }
  0x68   :  { %1891 = vmatprep.subr.bf16.mxu1 %v2705_v12  ;;  %775 = vmatprep.mubr.f32.mxu0 %v2718_v25  ;;  %v634_v29 = vld [vmem:[%s3189_s4 + $0x40] sm:$0xff]  ;;  %v635_v31 = vld [vmem:[%s3189_s4 + $0x48] sm:$0xff]  ;;  %v2825_v33 = vpack.c.bf16 %v683_v23, %v682_v22  ;;  %v653_v41 = vld [vmem:[%s3189_s4 + $0xd8] sm:$0xff] }
  0x69   :  { %845 = vmatprep.mubr.f32.mxu1 %v2729_v34  ;;  %v666_v32 = vld [vmem:[%s3189_s4 + $0x140] sm:$0xff]  ;;  %v667_v35 = vld [vmem:[%s3189_s4 + $0x148] sm:$0xff]  ;;  %v684_v36 = vld [vmem:[%s3189_s4 + $0x1d0] sm:$0xff]  ;;  %v2843_v37 = vpack.c.bf16 %v635_v31, %v634_v29  ;;  %v2849_v47 = vpack.c.bf16 %v653_v41, %v652_v40  ;;  %v2933_v40 = vrot.slane %v2686_v58, %v2401_v54  ;;  %v2937_v41 = vrot.slane %v2686_v58, %v2403_v56 }
  0x6a   :  { %1861 = vmatpush3.bf16.msra.mxu0 %v2733_v38  ;;  %v685_v44 = vld [vmem:[%s3189_s4 + $0x1d8] sm:$0xff]  ;;  %v2847_v45 = vpack.c.bf16 %v667_v35, %v666_v32  ;;  %v636_v48 = vld [vmem:[%s3189_s4 + $0x50] sm:$0xff]  ;;  %v654_v7 = vld [vmem:[%s3189_s4 + $0xe0] sm:$0xff]  ;;  %v2929_v35 = vmul.f32 %v2686_v58, %v2686_v58 }
  0x6b   :  { %1893 = vmatpush3.bf16.msra.mxu1 %v2737_v60  ;;  %1863 = vmatprep.subr.bf16.mxu0 %v2739_v39  ;;  %v637_v49 = vld [vmem:[%s3189_s4 + $0x58] sm:$0xff]  ;;  %v668_v50 = vld [vmem:[%s3189_s4 + $0x150] sm:$0xff]  ;;  %v2861_v55 = vpack.c.bf16 %v685_v44, %v684_v36  ;;  %v655_v8 = vld [vmem:[%s3189_s4 + $0xe8] sm:$0xff] }
  0x6c   :  { %1895 = vmatprep.subr.bf16.mxu1 %v2751_v52  ;;  %v669_v3 = vld [vmem:[%s3189_s4 + $0x158] sm:$0xff]  ;;  %v686_v16 = vld [vmem:[%s3189_s4 + $0x1e0] sm:$0xff]  ;;  %v687_v17 = vld [vmem:[%s3189_s4 + $0x1e8] sm:$0xff]  ;;  %v2879_v21 = vpack.c.bf16 %v637_v49, %v636_v48  ;;  %v2885_v30 = vpack.c.bf16 %v655_v8, %v654_v7  ;;  %v860_v36 = vrot.slane %v2929_v35, %v2328_v14  ;;  %v868_v44 = vrot.slane %v2929_v35, %v2330_v15 }
  0x6d   :  { %v2883_v26 = vpack.c.bf16 %v669_v3, %v668_v50  ;;  %v638_v43 = vld [vmem:[%s3189_s4 + $0x60] sm:$0xff]  ;;  %v639_v62 = vld [vmem:[%s3189_s4 + $0x68] sm:$0xff]  ;;  %v1910_v53 = vpack.c.bf16 %v687_v17, %v686_v16  ;;  %v656_v0 = vld [vmem:[%s3189_s4 + $0xf0] sm:$0xff] }
  0x6e   :  { %1865 = vmatpush3.bf16.msra.mxu0 %v2771_v4  ;;  %v670_v51 = vld [vmem:[%s3189_s4 + $0x160] sm:$0xff]  ;;  %v671_v57 = vld [vmem:[%s3189_s4 + $0x168] sm:$0xff]  ;;  %v657_v1 = vld [vmem:[%s3189_s4 + $0xf8] sm:$0xff]  ;;  %v1880_v10 = vpack.c.bf16 %v639_v62, %v638_v43 }
  0x6f   :  { %1897 = vmatpush3.bf16.msra.mxu1 %v2775_v5  ;;  %1867 = vmatprep.subr.bf16.mxu0 %v2777_v6  ;;  %v688_v2 = vld [vmem:[%s3189_s4 + $0x1f0] sm:$0xff]  ;;  %v689_v9 = vld [vmem:[%s3189_s4 + $0x1f8] sm:$0xff]  ;;  %v1912_v11 = vpack.c.bf16 %v671_v57, %v670_v51  ;;  %v1882_v18 = vpack.c.bf16 %v657_v1, %v656_v0  ;;  %v1029_v14 = vld [vmem:[%s3190_s5 + $0x80] sm:$0xff] }
  0x70   :  { %1899 = vmatprep.subr.bf16.mxu1 %v2789_v13  ;;  %v640_v19 = vld [vmem:[%s3189_s4 + $0x70] sm:$0xff]  ;;  %v641_v20 = vld [vmem:[%s3189_s4 + $0x78] sm:$0xff]  ;;  %v1914_v22 = vpack.c.bf16 %v689_v9, %v688_v2  ;;  %v1030_v15 = vld [vmem:[%s3190_s5 + $0x88] sm:$0xff] }
  0x71   :  { %v672_v23 = vld [vmem:[%s3189_s4 + $0x170] sm:$0xff]  ;;  %v673_v29 = vld [vmem:[%s3189_s4 + $0x178] sm:$0xff]  ;;  %v1884_v31 = vpack.c.bf16 %v641_v20, %v640_v19  ;;  %v1982_v58 = vpack.c.bf16 %v1030_v15, %v1029_v14  ;;  %v1065_v48 = vld [vmem:[%s3190_s5 + $0x1a0] sm:$0xff] }
  0x72   :  { %1869 = vmatpush3.bf16.msra.mxu0 %v2807_v24  ;;  %v1916_v32 = vpack.c.bf16 %v673_v29, %v672_v23  ;;  %v1066_v49 = vld [vmem:[%s3190_s5 + $0x1a8] sm:$0xff]  ;;  %v1017_v7 = vld [vmem:[%s3190_s5 + $0x20] sm:$0xff]  ;;  %v1067_v43 = vld [vmem:[%s3190_s5 + $0x1b0] sm:$0xff] }
  0x73   :  { %1901 = vmatpush3.bf16.msra.mxu1 %v2811_v27  ;;  %1871 = vmatprep.subr.bf16.mxu0 %v2813_v28  ;;  %v1018_v8 = vld [vmem:[%s3190_s5 + $0x28] sm:$0xff]  ;;  %v1049_v16 = vld [vmem:[%s3190_s5 + $0x120] sm:$0xff]  ;;  %v2022_v17 = vpack.c.bf16 %v1066_v49, %v1065_v48  ;;  %v1068_v62 = vld [vmem:[%s3190_s5 + $0x1b8] sm:$0xff] }
  0x74   :  { %1903 = vmatprep.subr.bf16.mxu1 %v2825_v33  ;;  %v1992_v51 = vpack.c.bf16 %v1018_v8, %v1017_v7  ;;  %v1020_v0 = vld [vmem:[%s3190_s5 + $0x38] sm:$0xff]  ;;  %v1051_v1 = vld [vmem:[%s3190_s5 + $0x130] sm:$0xff]  ;;  %v1037_v9 = vld [vmem:[%s3190_s5 + $0xc0] sm:$0xff] }
  0x75   :  { %v1052_v2 = vld [vmem:[%s3190_s5 + $0x138] sm:$0xff]  ;;  %v1021_v23 = vld [vmem:[%s3190_s5 + $0x40] sm:$0xff]  ;;  %v1022_v29 = vld [vmem:[%s3190_s5 + $0x48] sm:$0xff] }
  0x76   :  { %1873 = vmatpush3.bf16.msra.mxu0 %v2843_v37  ;;  %v2028_v20 = vpack.c.bf16 %v1052_v2, %v1051_v1  ;;  %v1071_v14 = vld [vmem:[%s3190_s5 + $0x1d0] sm:$0xff]  ;;  %v1072_v15 = vld [vmem:[%s3190_s5 + $0x1d8] sm:$0xff] }
  0x77   :  { %1905 = vmatpush3.bf16.msra.mxu1 %v2847_v45  ;;  %1875 = vmatprep.subr.bf16.mxu0 %v2849_v47  ;;  %v1059_v8 = vld [vmem:[%s3190_s5 + $0x170] sm:$0xff] }
  0x78   :  { %1907 = vmatprep.subr.bf16.mxu1 %v2861_v55 }
  0x7a   :  { %1877 = vmatpush3.bf16.msra.mxu0 %v2879_v21 }
  0x7b   :  { %1909 = vmatpush3.bf16.msra.mxu1 %v2883_v26  ;;  %1879 = vmatprep.subr.bf16.mxu0 %v2885_v30 }
  0x7c   :  { %1911 = vmatprep.subr.bf16.mxu1 %v1910_v53 }
  0x7e   :  { %1881 = vmatpush3.bf16.msra.mxu0 %v1880_v10 }
  0x7f   :  { %1913 = vmatpush3.bf16.msra.mxu1 %v1912_v11  ;;  %1883 = vmatprep.subr.bf16.mxu0 %v1882_v18 }
  0x80   :  { %1915 = vmatprep.subr.bf16.mxu1 %v1914_v22 }
  0x82   :  { %1885 = vmatpush3.bf16.msra.mxu0 %v1884_v31 }
  0x83   :  { %1917 = vmatpush3.bf16.msra.mxu1 %v1916_v32  ;;  %1919 = vmatprep.subr.bf16.mxu0 %v2655_v42  ;;  %v1061_v42 = vld [vmem:[%s3190_s5 + $0x180] sm:$0xff] }
  0x84   :  { %1951 = vmatprep.subr.bf16.mxu1 %v2666_v46  ;;  %v1062_v46 = vld [vmem:[%s3190_s5 + $0x188] sm:$0xff] }
  0x85   :  { %776 = vmatmul.mubr.f32.vlgmr.msra.gmra.mrb[6].mxu0 %v2933_v40 }
  0x86   :  { %846 = vmatmul.mubr.f32.vlgmr.msra.gmra.mrb[6].mxu1 %v2937_v41  ;;  %1921 = vmatpush3.bf16.msra.mxu0 %v2688_v59  ;;  %v1013_v59 = vld [vmem:[%s3190_s5] sm:$0xff] }
  0x87   :  { %1953 = vmatpush3.bf16.msra.mxu1 %v2691_v61  ;;  %1923 = vmatprep.subr.bf16.mxu0 %v2693_v63  ;;  %v1014_v61 = vld [vmem:[%s3190_s5 + $0x8] sm:$0xff]  ;;  %v1045_v63 = vld [vmem:[%s3190_s5 + $0x100] sm:$0xff] }
  0x88   :  { %1955 = vmatprep.subr.bf16.mxu1 %v2705_v12  ;;  %937 = vmatprep.mubr.f32.mxu0 %v860_v36  ;;  %v2014_v12 = vpack.c.bf16 %v1062_v46, %v1061_v42  ;;  %v1039_v36 = vld [vmem:[%s3190_s5 + $0xd0] sm:$0xff]  ;;  %v2000_v42 = vpack.c.bf16 %v1022_v29, %v1021_v23 }
  0x89   :  { %1007 = vmatprep.mubr.f32.mxu1 %v868_v44  ;;  %v1040_v44 = vld [vmem:[%s3190_s5 + $0xd8] sm:$0xff] }
  0x8a   :  { %1925 = vmatpush3.bf16.msra.mxu0 %v2733_v38  ;;  %v1046_v38 = vld [vmem:[%s3190_s5 + $0x108] sm:$0xff] }
  0x8b   :  { %1957 = vmatpush3.bf16.msra.mxu1 %v2737_v60  ;;  %1927 = vmatprep.subr.bf16.mxu0 %v2739_v39  ;;  %v1031_v60 = vld [vmem:[%s3190_s5 + $0x90] sm:$0xff]  ;;  %v1032_v39 = vld [vmem:[%s3190_s5 + $0x98] sm:$0xff] }
  0x8c   :  { %1959 = vmatprep.subr.bf16.mxu1 %v2751_v52  ;;  %v856_v52 = vrot.slane %v2929_v35, %v2401_v54  ;;  %v1015_v54 = vld [vmem:[%s3190_s5 + $0x10] sm:$0xff] }
  0x8e   :  { %1929 = vmatpush3.bf16.msra.mxu0 %v2771_v4  ;;  %v1063_v4 = vld [vmem:[%s3190_s5 + $0x190] sm:$0xff] }
  0x8f   :  { %1961 = vmatpush3.bf16.msra.mxu1 %v2775_v5  ;;  %1931 = vmatprep.subr.bf16.mxu0 %v2777_v6  ;;  %v1064_v5 = vld [vmem:[%s3190_s5 + $0x198] sm:$0xff]  ;;  %v864_v6 = vrot.slane %v2929_v35, %v2403_v56  ;;  %v1054_v35 = vld [vmem:[%s3190_s5 + $0x148] sm:$0xff] }
  0x90   :  { %1963 = vmatprep.subr.bf16.mxu1 %v2789_v13  ;;  %v1984_v13 = vpack.c.bf16 %v1014_v61, %v1013_v59  ;;  %v1048_v56 = vld [vmem:[%s3190_s5 + $0x118] sm:$0xff]  ;;  %v1023_v59 = vld [vmem:[%s3190_s5 + $0x50] sm:$0xff] }
  0x91   :  { %v1024_v61 = vld [vmem:[%s3190_s5 + $0x58] sm:$0xff] }
  0x92   :  { %1933 = vmatpush3.bf16.msra.mxu0 %v2807_v24  ;;  %v2016_v24 = vpack.c.bf16 %v1046_v38, %v1045_v63  ;;  %v1055_v63 = vld [vmem:[%s3190_s5 + $0x150] sm:$0xff]  ;;  %v1056_v38 = vld [vmem:[%s3190_s5 + $0x158] sm:$0xff] }
  0x93   :  { %1965 = vmatpush3.bf16.msra.mxu1 %v2811_v27  ;;  %1935 = vmatprep.subr.bf16.mxu0 %v2813_v28  ;;  %v1986_v27 = vpack.c.bf16 %v1032_v39, %v1031_v60  ;;  %v1016_v28 = vld [vmem:[%s3190_s5 + $0x18] sm:$0xff]  ;;  %v1041_v60 = vld [vmem:[%s3190_s5 + $0xe0] sm:$0xff]  ;;  %v1042_v39 = vld [vmem:[%s3190_s5 + $0xe8] sm:$0xff] }
  0x94   :  { %1967 = vmatprep.subr.bf16.mxu1 %v2825_v33  ;;  %v1047_v33 = vld [vmem:[%s3190_s5 + $0x110] sm:$0xff]  ;;  %v1988_v50 = vpack.c.bf16 %v1016_v28, %v1015_v54  ;;  %v1057_v54 = vld [vmem:[%s3190_s5 + $0x160] sm:$0xff] }
  0x96   :  { %1937 = vmatpush3.bf16.msra.mxu0 %v2843_v37  ;;  %v2018_v37 = vpack.c.bf16 %v1064_v5, %v1063_v4  ;;  %v1074_v4 = vld [vmem:[%s3190_s5 + $0x1e8] sm:$0xff]  ;;  %v2004_v5 = vpack.c.bf16 %v1024_v61, %v1023_v59 }
  0x97   :  { %1969 = vmatpush3.bf16.msra.mxu1 %v2847_v45  ;;  %1939 = vmatprep.subr.bf16.mxu0 %v2849_v47  ;;  %v1033_v45 = vld [vmem:[%s3190_s5 + $0xa0] sm:$0xff]  ;;  %v1034_v47 = vld [vmem:[%s3190_s5 + $0xa8] sm:$0xff] }
  0x98   :  { %1971 = vmatprep.subr.bf16.mxu1 %v2861_v55  ;;  %v2020_v55 = vpack.c.bf16 %v1048_v56, %v1047_v33  ;;  %v1990_v3 = vpack.c.bf16 %v1034_v47, %v1033_v45  ;;  %v1058_v33 = vld [vmem:[%s3190_s5 + $0x168] sm:$0xff]  ;;  %v1044_v56 = vld [vmem:[%s3190_s5 + $0xf8] sm:$0xff]  ;;  %v1075_v45 = vld [vmem:[%s3190_s5 + $0x1f0] sm:$0xff] }
  0x99   :  { %v1076_v47 = vld [vmem:[%s3190_s5 + $0x1f8] sm:$0xff]  ;;  %v2040_v49 = vpack.c.bf16 %v1058_v33, %v1057_v54 }
  0x9a   :  { %1941 = vmatpush3.bf16.msra.mxu0 %v2879_v21  ;;  %v1050_v21 = vld [vmem:[%s3190_s5 + $0x128] sm:$0xff]  ;;  %v2042_v7 = vpack.c.bf16 %v1076_v47, %v1075_v45  ;;  %v1224_v45 = vstv %s3191_s6 }
  0x9b   :  { %1973 = vmatpush3.bf16.msra.mxu1 %v2883_v26  ;;  %1943 = vmatprep.subr.bf16.mxu0 %v2885_v30  ;;  %v1035_v26 = vld [vmem:[%s3190_s5 + $0xb0] sm:$0xff]  ;;  %v1036_v30 = vld [vmem:[%s3190_s5 + $0xb8] sm:$0xff] }
  0x9c   :  { %1975 = vmatprep.subr.bf16.mxu1 %v1910_v53  ;;  %v2024_v53 = vpack.c.bf16 %v1050_v21, %v1049_v16  ;;  %v1994_v57 = vpack.c.bf16 %v1036_v30, %v1035_v26  ;;  %v1060_v16 = vld [vmem:[%s3190_s5 + $0x178] sm:$0xff] }
  0x9d   :  { %v2044_v21 = vpack.c.bf16 %v1060_v16, %v1059_v8 }
  0x9e   :  { %1945 = vmatpush3.bf16.msra.mxu0 %v1880_v10  ;;  %v1038_v10 = vld [vmem:[%s3190_s5 + $0xc8] sm:$0xff] }
  0x9f   :  { %1977 = vmatpush3.bf16.msra.mxu1 %v1912_v11  ;;  %1947 = vmatprep.subr.bf16.mxu0 %v1882_v18  ;;  %v1069_v11 = vld [vmem:[%s3190_s5 + $0x1c0] sm:$0xff]  ;;  %v1070_v18 = vld [vmem:[%s3190_s5 + $0x1c8] sm:$0xff] }
  0xa0   :  { %1979 = vmatprep.subr.bf16.mxu1 %v1914_v22  ;;  %v1998_v22 = vpack.c.bf16 %v1038_v10, %v1037_v9 }
  0xa2   :  { %1949 = vmatpush3.bf16.msra.mxu0 %v1884_v31  ;;  %v1053_v31 = vld [vmem:[%s3190_s5 + $0x140] sm:$0xff] }
  0xa3   :  { %1981 = vmatpush3.bf16.msra.mxu1 %v1916_v32  ;;  %1983 = vmatprep.subr.bf16.mxu0 %v1982_v58  ;;  %v2030_v32 = vpack.c.bf16 %v1070_v18, %v1069_v11  ;;  %v2032_v46 = vpack.c.bf16 %v1054_v35, %v1053_v31  ;;  %v2002_v58 = vpack.c.bf16 %v1040_v44, %v1039_v36 }
  0xa4   :  { %2015 = vmatprep.subr.bf16.mxu1 %v2014_v12  ;;  %v2034_v12 = vpack.c.bf16 %v1072_v15, %v1071_v14 }
  0xa5   :  { %938 = vmatmul.mubr.f32.vlgmr.msra.gmra.mrb[8].mxu0 %v856_v52  ;;  %v1073_v52 = vld [vmem:[%s3190_s5 + $0x1e0] sm:$0xff] }
  0xa6   :  { %1008 = vmatmul.mubr.f32.vlgmr.msra.gmra.mrb[8].mxu1 %v864_v6  ;;  %1985 = vmatpush3.bf16.msra.mxu0 %v1984_v13  ;;  %v2036_v6 = vpack.c.bf16 %v1056_v38, %v1055_v63  ;;  %v2006_v13 = vpack.c.bf16 %v1042_v39, %v1041_v60  ;;  %v2038_v28 = vpack.c.bf16 %v1074_v4, %v1073_v52 }
  0xa7   :  { %2017 = vmatpush3.bf16.msra.mxu1 %v2016_v24  ;;  %1987 = vmatprep.subr.bf16.mxu0 %v1986_v27  ;;  %v1025_v24 = vld [vmem:[%s3190_s5 + $0x60] sm:$0xff]  ;;  %v1026_v27 = vld [vmem:[%s3190_s5 + $0x68] sm:$0xff] }
  0xa8   :  { %2019 = vmatprep.subr.bf16.mxu1 %v2018_v37  ;;  %1141 = vmatprep.mubr.f32.mxu0 %v2718_v25  ;;  %v1019_v25 = vld [vmem:[%s3190_s5 + $0x30] sm:$0xff]  ;;  %v2008_v48 = vpack.c.bf16 %v1026_v27, %v1025_v24 }
  0xa9   :  { %1211 = vmatprep.mubr.f32.mxu1 %v2729_v34  ;;  %v2026_v34 = vpack.c.bf16 %v1068_v62, %v1067_v43  ;;  %v1996_v19 = vpack.c.bf16 %v1020_v0, %v1019_v25  ;;  %v1043_v37 = vld [vmem:[%s3190_s5 + $0xf0] sm:$0xff] }
  0xaa   :  { %1989 = vmatpush3.bf16.msra.mxu0 %v1988_v50  ;;  %v2010_v50 = vpack.c.bf16 %v1044_v56, %v1043_v37 }
  0xab   :  { %2021 = vmatpush3.bf16.msra.mxu1 %v2020_v55  ;;  %1991 = vmatprep.subr.bf16.mxu0 %v1990_v3  ;;  %v1027_v55 = vld [vmem:[%s3190_s5 + $0x70] sm:$0xff]  ;;  %v1028_v3 = vld [vmem:[%s3190_s5 + $0x78] sm:$0xff] }
  0xac   :  { %2023 = vmatprep.subr.bf16.mxu1 %v2022_v17  ;;  %v2012_v17 = vpack.c.bf16 %v1028_v3, %v1027_v55 }
  0xae   :  { %1993 = vmatpush3.bf16.msra.mxu0 %v1992_v51 }
  0xaf   :  { %2025 = vmatpush3.bf16.msra.mxu1 %v2024_v53  ;;  %1995 = vmatprep.subr.bf16.mxu0 %v1994_v57 }
  0xb0   :  { %2027 = vmatprep.subr.bf16.mxu1 %v2026_v34 }
  0xb2   :  { %1997 = vmatpush3.bf16.msra.mxu0 %v1996_v19 }
  0xb3   :  { %2029 = vmatpush3.bf16.msra.mxu1 %v2028_v20  ;;  %1999 = vmatprep.subr.bf16.mxu0 %v1998_v22 }
  0xb4   :  { %2031 = vmatprep.subr.bf16.mxu1 %v2030_v32 }
  0xb6   :  { %2001 = vmatpush3.bf16.msra.mxu0 %v2000_v42 }
  0xb7   :  { %2033 = vmatpush3.bf16.msra.mxu1 %v2032_v46  ;;  %2003 = vmatprep.subr.bf16.mxu0 %v2002_v58 }
  0xb8   :  { %2035 = vmatprep.subr.bf16.mxu1 %v2034_v12 }
  0xba   :  { %2005 = vmatpush3.bf16.msra.mxu0 %v2004_v5 }
  0xbb   :  { %2037 = vmatpush3.bf16.msra.mxu1 %v2036_v6  ;;  %2007 = vmatprep.subr.bf16.mxu0 %v2006_v13 }
  0xbc   :  { %2039 = vmatprep.subr.bf16.mxu1 %v2038_v28 }
  0xbe   :  { %2009 = vmatpush3.bf16.msra.mxu0 %v2008_v48 }
  0xbf   :  { %2041 = vmatpush3.bf16.msra.mxu1 %v2040_v49  ;;  %2011 = vmatprep.subr.bf16.mxu0 %v2010_v50 }
  0xc0   :  { %2043 = vmatprep.subr.bf16.mxu1 %v2042_v7 }
  0xc2   :  { %2013 = vmatpush3.bf16.msra.mxu0 %v2012_v17 }
  0xc3   :  { %2045 = vmatpush3.bf16.msra.mxu1 %v2044_v21 }
  0xc5   :  { %1142 = vmatmul.mubr.f32.vlgmr.msra.gmra.mrb[10].mxu0 %v2933_v40 }
  0xc6   :  { %1212 = vmatmul.mubr.f32.vlgmr.msra.gmra.mrb[10].mxu1 %v2937_v41 }
  0xf8   :  { %v1274_v26 = vpop.f32.mrb[0].mxu0 }
  0xf9   :  { %v1309_v30 = vpop.f32.mrb[0].mxu1  ;;  %v1275_v43 = vpop.f32.mrb[1].mxu0 }
  0xfa   :  { %v1276_v62 = vadd.f32 %v1275_v43, %v1274_v26  ;;  %v1310_v51 = vpop.f32.mrb[1].mxu1 }
  0xfb   :  { %v1311_v53 = vadd.f32 %v1310_v51, %v1309_v30 }
  0xfd   :  { %v251_v57 = vadd.f32 %v1311_v53, %v1276_v62 }
  0xff   :  { %v620_v10 = vmul.f32 %v251_v57, %v251_v57 }
 0x118   :  { %v1344_v25 = vpop.f32.mrb[2].mxu0 }
 0x119   :  { %v1379_v0 = vpop.f32.mrb[2].mxu1  ;;  %v1345_v1 = vpop.f32.mrb[3].mxu0 }
 0x11a   :  { %v1346_v34 = vadd.f32 %v1345_v1, %v1344_v25  ;;  %v1380_v2 = vpop.f32.mrb[3].mxu1 }
 0x11b   :  { %v1381_v9 = vadd.f32 %v1380_v2, %v1379_v0 }
 0x11d   :  { %v413_v11 = vadd.f32 %v1381_v9, %v1346_v34 }
 0x11f   :  { %v621_v18 = vsub.f32 %v413_v11, %v620_v10 }
 0x121   :  { %v622_v19 = vadd.f32 1e-05, %v621_v18 }
 0x123   :  { %2047 = vrsqrt.f32 %v622_v19 }
 0x12d   :  { %v2048_v32 = vpop.eup %2047 }
 0x138   :  { %v1414_v40 = vpop.f32.mrb[4].mxu0 }
 0x139   :  { %v1449_v41 = vpop.f32.mrb[4].mxu1  ;;  %v1415_v20 = vpop.f32.mrb[5].mxu0 }
 0x13a   :  { %v1416_v22 = vadd.f32 %v1415_v20, %v1414_v40  ;;  %v1450_v23 = vpop.f32.mrb[5].mxu1 }
 0x13b   :  { %v1451_v29 = vadd.f32 %v1450_v23, %v1449_v41 }
 0x13d   :  { %v617_v31 = vadd.f32 %v1451_v29, %v1416_v22 }
 0x13f   :  { %v624_v35 = vmul.f32 %v2048_v32, %v617_v31 }
 0x158   :  { %v1484_v36 = vpop.f32.mrb[6].mxu0 }
 0x159   :  { %v1519_v44 = vpop.f32.mrb[6].mxu1  ;;  %v1485_v14 = vpop.f32.mrb[7].mxu0 }
 0x15a   :  { %v1486_v15 = vadd.f32 %v1485_v14, %v1484_v36  ;;  %v1520_v42 = vpop.f32.mrb[7].mxu1 }
 0x15b   :  { %v1521_v46 = vadd.f32 %v1520_v42, %v1519_v44 }
 0x15d   :  { %v848_v58 = vadd.f32 %v1521_v46, %v1486_v15 }
 0x15f   :  { %v1217_v39 = vmul.f32 %v848_v58, %v848_v58 }
 0x178   :  { %v1554_v59 = vpop.f32.mrb[8].mxu0 }
 0x179   :  { %v1589_v61 = vpop.f32.mrb[8].mxu1  ;;  %v1555_v63 = vpop.f32.mrb[9].mxu0 }
 0x17a   :  { %v1556_v12 = vadd.f32 %v1555_v63, %v1554_v59  ;;  %v1590_v38 = vpop.f32.mrb[9].mxu1 }
 0x17b   :  { %v1591_v60 = vadd.f32 %v1590_v38, %v1589_v61 }
 0x17d   :  { %v1010_v52 = vadd.f32 %v1591_v60, %v1556_v12 }
 0x17f   :  { %v1218_v4 = vsub.f32 %v1010_v52, %v1217_v39 }
 0x181   :  { %v1219_v5 = vadd.f32 1e-05, %v1218_v4 }
 0x183   :  { %2049 = vrsqrt.f32 %v1219_v5 }
 0x18d   :  { %v2050_v37 = vpop.eup %2049 }
 0x198   :  { %v1624_v6 = vpop.f32.mrb[10].mxu0 }
 0x199   :  { %v1659_v13 = vpop.f32.mrb[10].mxu1  ;;  %v1625_v24 = vpop.f32.mrb[11].mxu0 }
 0x19a   :  { %v1626_v27 = vadd.f32 %v1625_v24, %v1624_v6  ;;  %v1660_v54 = vpop.f32.mrb[11].mxu1 }
 0x19b   :  { %v1661_v28 = vadd.f32 %v1660_v54, %v1659_v13 }
 0x19d   :  { %v1214_v33 = vadd.f32 %v1661_v28, %v1626_v27 }
 0x19f   :  { %v1221_v56 = vmul.f32 %v2050_v37, %v1214_v33 }
 0x1a1   :  { %v1222_v47 = vadd.f32 %v1221_v56, %v624_v35 }
 0x1a3   :  { %v1225_v48 = vadd.f32 %v1224_v45, %v1222_v47 }
 0x1a5   :  { %1227 = vst.msk [vmem:[#allocation3] sm:$0x1] %vm1226_vm0, %v1225_v48 }
 0x1a6   :  { %2062 = shalt.err (!%p2059_p4)
}
 0x1a7   :  { %s2063_s9 = scalar_lea.hbm %s3192_s7, 16 }
 0x1a8   :  { %p2064_p5 = scmp.ne.s32.totalorder %s3192_s7, %s2063_s9  ;;  %p2067_p6 = scmp.lt.u32.totalorder %s2063_s9, %s3192_s7 }
 0x1aa   :  { %p2069_p7 = pnand %p2067_p6, %p2064_p5 }
 0x1ac   :  { %2072 = shalt.err (!%p2069_p7)
}
 0x1ad   :  { %1237 = dma.vmem_to_hbm [thread:$0]  %s1235_s27, 16, %s3192_s7, [#allocation4]  }
 0x1ae   :  { %2073 = dma.done.wait [#allocation4], 16  }
 0x1af   :  { %2074 = vsyncadd [#allocation4], 4294967280 }
 0x1b0   :  { %1241 = vsyncpa [#allocation4], 1 }

</bundles_post_ra>
